<compile_context>
chip_gen: v6e
topology: v6e:2x2x1
jax: 0.10.0
libtpu: 0.0.40
codegen_flags: <defaults>
</compile_context>

<pallas_src>
import functools

import jax
import jax.numpy as jnp
from jax.experimental import pallas as pl
from jax.experimental.pallas import tpu as pltpu

_BN_EPS = 1e-5


# ----------------------------------------------------------------------------
# helpers
# ----------------------------------------------------------------------------
def _round_up(x, m):
    return (x + m - 1) // m * m


def _vmem_limit_bytes():
    """3/4 of physical VMEM: ~96 MiB on v5e/v6e (128 MiB), ~48 MiB on v7x (64 MiB)."""
    try:
        info = pltpu.get_tpu_info()
        cap = int(getattr(info, "vmem_capacity_bytes", 64 * 1024 * 1024))
    except Exception:  # interpret mode / unknown platform
        cap = 64 * 1024 * 1024
    return int(max(16 * 1024 * 1024, (cap // 4) * 3))


# ----------------------------------------------------------------------------
# fused TabularMlp kernel
# ----------------------------------------------------------------------------
def _tabular_mlp_kernel(x_ref, w1_ref, g1_ref, t1_ref, w2_ref, g2_ref, t2_ref,
                        o_ref, *, batch, eps):
    """Fused Linear -> BN1d(train) -> ReLU -> Linear -> BN1d(train) -> ReLU.

    x_ref:(Bp,F) f32, w1_ref:(F,H1) f32, w2_ref:(H1,H2) f32,
    gamma/beta refs:(1,H) f32, o_ref:(Bp,H2) f32.
    Linear biases are omitted: they cancel exactly against the train-mode
    BatchNorm mean subtraction.  Padded batch rows are zero in x.
    """
    bp = x_ref.shape[0]
    inv_b = 1.0 / float(batch)

    def bn_scale_shift(h, g, t):
        # Biased batch stats via sum / sum-of-squares.  Padded rows of `h` are
        # exactly zero, so dividing the unmasked sums by the *real* batch size
        # gives exact statistics without any masking passes.
        mean = jnp.sum(h, axis=0, keepdims=True) * inv_b
        var = jnp.sum(h * h, axis=0, keepdims=True) * inv_b - mean * mean
        var = jnp.maximum(var, 0.0)                      # guard rounding
        s = g * jax.lax.rsqrt(var + eps)                 # (1, H)
        c = t - mean * s                                 # (1, H)
        return s, c

    # ---- layer 1: x @ W1^T ; fused BN(train) + affine + ReLU ----------------
    h = jnp.dot(x_ref[...].astype(jnp.bfloat16),
                w1_ref[...].astype(jnp.bfloat16),
                preferred_element_type=jnp.float32)
    s1, c1 = bn_scale_shift(h, g1_ref[...], t1_ref[...])
    a = jnp.maximum(h * s1 + c1, 0.0)
    if bp > batch:
        # Re-zero padded rows (one select) so layer-2 stats stay mask-free.
        row = jax.lax.broadcasted_iota(jnp.int32, (bp, 1), 0)
        a = jnp.where(row < batch, a, 0.0)
    a = a.astype(jnp.bfloat16)

    # ---- layer 2: a @ W2^T ; fused BN(train) + affine + ReLU ----------------
    y = jnp.dot(a, w2_ref[...].astype(jnp.bfloat16),
                preferred_element_type=jnp.float32)
    s2, c2 = bn_scale_shift(y, g2_ref[...], t2_ref[...])
    o_ref[...] = jnp.maximum(y * s2 + c2, 0.0)


def tabular_mlp_forward(x, params):
    """x: (B, input_size) f32 -> (B, output_size) f32 (PyTorch TabularMlp.forward)."""
    B, F = x.shape
    H1 = params["w1"].shape[0]          # 64
    H2 = params["w2"].shape[0]          # output_size

    Bp = _round_up(B, 8)                # sublane alignment only; no lane padding

    x_p = x.astype(jnp.float32)
    if Bp != B:
        x_p = jnp.pad(x_p, ((0, Bp - B), (0, 0)))        # zero rows -> exact stats

    w1t = params["w1"].T.astype(jnp.float32)              # (F, H1)
    w2t = params["w2"].T.astype(jnp.float32)              # (H1, H2)
    g1 = params["g1"].reshape(1, H1).astype(jnp.float32)
    t1 = params["t1"].reshape(1, H1).astype(jnp.float32)
    g2 = params["g2"].reshape(1, H2).astype(jnp.float32)
    t2 = params["t2"].reshape(1, H2).astype(jnp.float32)
    # NOTE: params["b1"]/["b2"] are intentionally NOT passed: a bias immediately
    # before train-mode BatchNorm cancels exactly in (h - mean).

    kernel = functools.partial(_tabular_mlp_kernel, batch=B, eps=_BN_EPS)

    flops = 2 * B * (F * H1 + H1 * H2)
    bytes_accessed = (Bp * F * 4 + F * H1 * 4 + H1 * H2 * 4
                      + 2 * (H1 + H2) * 4 + Bp * H2 * 4)

    out_p = pl.pallas_call(
        kernel,
        out_shape=jax.ShapeDtypeStruct((Bp, H2), jnp.float32),
        grid=(1,),
        in_specs=[
            pl.BlockSpec((Bp, F), lambda i: (0, 0)),      # x (unpadded features)
            pl.BlockSpec((F, H1), lambda i: (0, 0)),      # W1^T
            pl.BlockSpec((1, H1), lambda i: (0, 0)),      # gamma1
            pl.BlockSpec((1, H1), lambda i: (0, 0)),      # beta1
            pl.BlockSpec((H1, H2), lambda i: (0, 0)),     # W2^T
            pl.BlockSpec((1, H2), lambda i: (0, 0)),      # gamma2
            pl.BlockSpec((1, H2), lambda i: (0, 0)),      # beta2
        ],
        out_specs=pl.BlockSpec((Bp, H2), lambda i: (0, 0)),
        compiler_params=pltpu.CompilerParams(
            dimension_semantics=("arbitrary",),
            vmem_limit_bytes=_vmem_limit_bytes()),
        cost_estimate=pl.CostEstimate(flops=flops, transcendentals=0,
                                      bytes_accessed=bytes_accessed),
    )(x_p, w1t, g1, t1, w2t, g2, t2)

    return out_p[:B] if Bp != B else out_p


# ----------------------------------------------------------------------------
# pure-JAX reference (PyTorch math incl. biases; same bf16 matmul operand casts)
# ----------------------------------------------------------------------------
def _tabular_mlp_ref(x, params, eps=_BN_EPS):
    def bn(h):
        mean = jnp.mean(h, axis=0, keepdims=True)
        var = jnp.mean((h - mean) ** 2, axis=0, keepdims=True)
        return (h - mean) * jax.lax.rsqrt(var + eps)

    h = jnp.dot(x.astype(jnp.bfloat16), params["w1"].T.astype(jnp.bfloat16),
                preferred_element_type=jnp.float32) + params["b1"]
    h = bn(h) * params["g1"] + params["t1"]
    h = jnp.maximum(h, 0.0)
    y = jnp.dot(h.astype(jnp.bfloat16), params["w2"].T.astype(jnp.bfloat16),
                preferred_element_type=jnp.float32) + params["b2"]
    y = bn(y) * params["g2"] + params["t2"]
    return jnp.maximum(y, 0.0)


# ----------------------------------------------------------------------------
if __name__ == "__main__":
    input_size, output_size = 10, 32   # TabularMlp(input_size, output_size); hidden1 = 64
    B = 2

    key = jax.random.PRNGKey(0)
    ks = jax.random.split(key, 9)
    params = {
        "w1": (input_size ** -0.5) * jax.random.normal(ks[0], (64, input_size), jnp.float32),
        "b1": 0.1 * jax.random.normal(ks[1], (64,), jnp.float32),
        "g1": 1.0 + 0.1 * jax.random.normal(ks[2], (64,), jnp.float32),
        "t1": 0.1 * jax.random.normal(ks[3], (64,), jnp.float32),
        "w2": (64 ** -0.5) * jax.random.normal(ks[4], (output_size, 64), jnp.float32),
        "b2": 0.1 * jax.random.normal(ks[5], (output_size,), jnp.float32),
        "g2": 1.0 + 0.1 * jax.random.normal(ks[6], (output_size,), jnp.float32),
        "t2": 0.1 * jax.random.normal(ks[7], (output_size,), jnp.float32),
    }
    x = jax.random.normal(ks[8], (B, input_size), jnp.float32)

    fwd = jax.jit(tabular_mlp_forward)
    out = jax.block_until_ready(fwd(x, params))
    assert out.shape == (B, output_size), out.shape
    assert bool(jnp.all(jnp.isfinite(out)))

    ref = jax.block_until_ready(_tabular_mlp_ref(x, params))
    max_err = float(jnp.max(jnp.abs(out - ref)))
    assert max_err < 2e-2, f"max abs error vs reference: {max_err}"

    print("KERNEL_OK")
</pallas_src>

<mosaic_0001>
module attributes {stable_mosaic.version = 11 : i64} {
  func.func @_tabular_mlp_kernel(%arg0: i32, %arg1: memref<8x10xf32, #tpu.memory_space<vmem>>, %arg2: memref<10x64xf32, #tpu.memory_space<vmem>>, %arg3: memref<1x64xf32, #tpu.memory_space<vmem>>, %arg4: memref<1x64xf32, #tpu.memory_space<vmem>>, %arg5: memref<64x32xf32, #tpu.memory_space<vmem>>, %arg6: memref<1x32xf32, #tpu.memory_space<vmem>>, %arg7: memref<1x32xf32, #tpu.memory_space<vmem>>, %arg8: memref<8x32xf32, #tpu.memory_space<vmem>>) attributes {dimension_semantics = [#tpu.dimension_semantics<arbitrary>], iteration_bounds = array<i64: 1>, scalar_prefetch = 0 : i64, scratch_operands = 0 : i64, tpu.core_type = #tpu.core_type<tc>, window_params = [{pipeline_mode = #tpu.pipeline_mode<synchronous>, transform_indices = @transform_0, window_bounds = array<i64: 8, 10>}, {pipeline_mode = #tpu.pipeline_mode<synchronous>, transform_indices = @transform_1, window_bounds = array<i64: 10, 64>}, {pipeline_mode = #tpu.pipeline_mode<synchronous>, transform_indices = @transform_2, window_bounds = array<i64: 1, 64>}, {pipeline_mode = #tpu.pipeline_mode<synchronous>, transform_indices = @transform_3, window_bounds = array<i64: 1, 64>}, {pipeline_mode = #tpu.pipeline_mode<synchronous>, transform_indices = @transform_4, window_bounds = array<i64: 64, 32>}, {pipeline_mode = #tpu.pipeline_mode<synchronous>, transform_indices = @transform_5, window_bounds = array<i64: 1, 32>}, {pipeline_mode = #tpu.pipeline_mode<synchronous>, transform_indices = @transform_6, window_bounds = array<i64: 1, 32>}, {pipeline_mode = #tpu.pipeline_mode<synchronous>, transform_indices = @transform_7, window_bounds = array<i64: 8, 32>}]} {
    %c0 = arith.constant 0 : index
    %c0_0 = arith.constant 0 : index
    %0 = vector.load %arg1[%c0, %c0_0] : memref<8x10xf32, #tpu.memory_space<vmem>>, vector<8x10xf32>
    %1 = arith.truncf %0 : vector<8x10xf32> to vector<8x10xbf16>
    %c0_1 = arith.constant 0 : index
    %c0_2 = arith.constant 0 : index
    %2 = vector.load %arg2[%c0_1, %c0_2] : memref<10x64xf32, #tpu.memory_space<vmem>>, vector<10x64xf32>
    %3 = arith.truncf %2 : vector<10x64xf32> to vector<10x64xbf16>
    %cst = arith.constant dense<0.000000e+00> : vector<8x64xf32>
    %4 = tpu.matmul %1, %3, %cst {dimension_numbers = #tpu.dot_dimension_numbers<[1], [0], [0], [1], [0, 0, 1, 1], [], []>} : vector<8x10xbf16>, vector<10x64xbf16>, vector<8x64xf32> -> vector<8x64xf32>
    %c0_3 = arith.constant 0 : index
    %c0_4 = arith.constant 0 : index
    %5 = vector.load %arg3[%c0_3, %c0_4] : memref<1x64xf32, #tpu.memory_space<vmem>>, vector<1x64xf32>
    %c0_5 = arith.constant 0 : index
    %c0_6 = arith.constant 0 : index
    %6 = vector.load %arg4[%c0_5, %c0_6] : memref<1x64xf32, #tpu.memory_space<vmem>>, vector<1x64xf32>
    %cst_7 = arith.constant dense<0.000000e+00> : vector<64xf32>
    %7 = vector.multi_reduction <add>, %4, %cst_7 [0] : vector<8x64xf32> to vector<64xf32>
    %8 = vector.shape_cast %7 : vector<64xf32> to vector<1x64xf32>
    %cst_8 = arith.constant 5.000000e-01 : f32
    %9 = vector.broadcast %cst_8 : f32 to vector<1x64xf32>
    %10 = arith.mulf %8, %9 : vector<1x64xf32>
    %11 = arith.mulf %4, %4 : vector<8x64xf32>
    %cst_9 = arith.constant dense<0.000000e+00> : vector<64xf32>
    %12 = vector.multi_reduction <add>, %11, %cst_9 [0] : vector<8x64xf32> to vector<64xf32>
    %13 = vector.shape_cast %12 : vector<64xf32> to vector<1x64xf32>
    %cst_10 = arith.constant 5.000000e-01 : f32
    %14 = vector.broadcast %cst_10 : f32 to vector<1x64xf32>
    %15 = arith.mulf %13, %14 : vector<1x64xf32>
    %16 = arith.mulf %10, %10 : vector<1x64xf32>
    %17 = arith.subf %15, %16 : vector<1x64xf32>
    %cst_11 = arith.constant 0.000000e+00 : f32
    %18 = vector.broadcast %cst_11 : f32 to vector<1x64xf32>
    %19 = arith.maximumf %17, %18 : vector<1x64xf32>
    %cst_12 = arith.constant 9.99999974E-6 : f32
    %20 = vector.broadcast %cst_12 : f32 to vector<1x64xf32>
    %21 = arith.addf %19, %20 : vector<1x64xf32>
    %22 = math.rsqrt %21 : vector<1x64xf32>
    %23 = arith.mulf %5, %22 : vector<1x64xf32>
    %24 = arith.mulf %10, %23 : vector<1x64xf32>
    %25 = arith.subf %6, %24 : vector<1x64xf32>
    %26 = vector.broadcast %23 : vector<1x64xf32> to vector<8x64xf32>
    %27 = arith.mulf %4, %26 : vector<8x64xf32>
    %28 = vector.broadcast %25 : vector<1x64xf32> to vector<8x64xf32>
    %29 = arith.addf %27, %28 : vector<8x64xf32>
    %cst_13 = arith.constant 0.000000e+00 : f32
    %30 = vector.broadcast %cst_13 : f32 to vector<8x64xf32>
    %31 = arith.maximumf %29, %30 : vector<8x64xf32>
    %32 = tpu.iota {dimensions = array<i32: 0>} : vector<8x1xi32>
    %c2_i32 = arith.constant 2 : i32
    %33 = vector.broadcast %c2_i32 : i32 to vector<8x1xi32>
    %34 = arith.cmpi slt, %32, %33 : vector<8x1xi32>
    %cst_14 = arith.constant 0.000000e+00 : f32
    %35 = vector.shape_cast %34 : vector<8x1xi1> to vector<8x1xi1>
    %36 = vector.broadcast %35 : vector<8x1xi1> to vector<8x64xi1>
    %37 = vector.broadcast %cst_14 : f32 to vector<8x64xf32>
    %38 = arith.select %36, %31, %37 : vector<8x64xi1>, vector<8x64xf32>
    %39 = arith.truncf %38 : vector<8x64xf32> to vector<8x64xbf16>
    %c0_15 = arith.constant 0 : index
    %c0_16 = arith.constant 0 : index
    %40 = vector.load %arg5[%c0_15, %c0_16] : memref<64x32xf32, #tpu.memory_space<vmem>>, vector<64x32xf32>
    %41 = arith.truncf %40 : vector<64x32xf32> to vector<64x32xbf16>
    %cst_17 = arith.constant dense<0.000000e+00> : vector<8x32xf32>
    %42 = tpu.matmul %39, %41, %cst_17 {dimension_numbers = #tpu.dot_dimension_numbers<[1], [0], [0], [1], [0, 0, 1, 1], [], []>} : vector<8x64xbf16>, vector<64x32xbf16>, vector<8x32xf32> -> vector<8x32xf32>
    %c0_18 = arith.constant 0 : index
    %c0_19 = arith.constant 0 : index
    %43 = vector.load %arg6[%c0_18, %c0_19] : memref<1x32xf32, #tpu.memory_space<vmem>>, vector<1x32xf32>
    %c0_20 = arith.constant 0 : index
    %c0_21 = arith.constant 0 : index
    %44 = vector.load %arg7[%c0_20, %c0_21] : memref<1x32xf32, #tpu.memory_space<vmem>>, vector<1x32xf32>
    %cst_22 = arith.constant dense<0.000000e+00> : vector<32xf32>
    %45 = vector.multi_reduction <add>, %42, %cst_22 [0] : vector<8x32xf32> to vector<32xf32>
    %46 = vector.shape_cast %45 : vector<32xf32> to vector<1x32xf32>
    %cst_23 = arith.constant 5.000000e-01 : f32
    %47 = vector.broadcast %cst_23 : f32 to vector<1x32xf32>
    %48 = arith.mulf %46, %47 : vector<1x32xf32>
    %49 = arith.mulf %42, %42 : vector<8x32xf32>
    %cst_24 = arith.constant dense<0.000000e+00> : vector<32xf32>
    %50 = vector.multi_reduction <add>, %49, %cst_24 [0] : vector<8x32xf32> to vector<32xf32>
    %51 = vector.shape_cast %50 : vector<32xf32> to vector<1x32xf32>
    %cst_25 = arith.constant 5.000000e-01 : f32
    %52 = vector.broadcast %cst_25 : f32 to vector<1x32xf32>
    %53 = arith.mulf %51, %52 : vector<1x32xf32>
    %54 = arith.mulf %48, %48 : vector<1x32xf32>
    %55 = arith.subf %53, %54 : vector<1x32xf32>
    %cst_26 = arith.constant 0.000000e+00 : f32
    %56 = vector.broadcast %cst_26 : f32 to vector<1x32xf32>
    %57 = arith.maximumf %55, %56 : vector<1x32xf32>
    %cst_27 = arith.constant 9.99999974E-6 : f32
    %58 = vector.broadcast %cst_27 : f32 to vector<1x32xf32>
    %59 = arith.addf %57, %58 : vector<1x32xf32>
    %60 = math.rsqrt %59 : vector<1x32xf32>
    %61 = arith.mulf %43, %60 : vector<1x32xf32>
    %62 = arith.mulf %48, %61 : vector<1x32xf32>
    %63 = arith.subf %44, %62 : vector<1x32xf32>
    %64 = vector.broadcast %61 : vector<1x32xf32> to vector<8x32xf32>
    %65 = arith.mulf %42, %64 : vector<8x32xf32>
    %66 = vector.broadcast %63 : vector<1x32xf32> to vector<8x32xf32>
    %67 = arith.addf %65, %66 : vector<8x32xf32>
    %cst_28 = arith.constant 0.000000e+00 : f32
    %68 = vector.broadcast %cst_28 : f32 to vector<8x32xf32>
    %69 = arith.maximumf %67, %68 : vector<8x32xf32>
    %c0_29 = arith.constant 0 : index
    %c0_30 = arith.constant 0 : index
    %70 = vector.load %arg8[%c0_29, %c0_30] : memref<8x32xf32, #tpu.memory_space<vmem>>, vector<8x32xf32>
    tpu.vector_store %arg8[%c0_29, %c0_30], %69 {strides = array<i32>} : memref<8x32xf32, #tpu.memory_space<vmem>>, vector<8x32xf32>,
    return
  }
  func.func @transform_0(%arg0: i32) -> (i32, i32) {
    %c0_i32 = arith.constant 0 : i32
    %c0_i32_0 = arith.constant 0 : i32
    %c0_i32_1 = arith.constant 0 : i32
    return %c0_i32, %c0_i32_0 : i32, i32
  }
  func.func @transform_1(%arg0: i32) -> (i32, i32) {
    %c0_i32 = arith.constant 0 : i32
    %c0_i32_0 = arith.constant 0 : i32
    %c0_i32_1 = arith.constant 0 : i32
    return %c0_i32, %c0_i32_0 : i32, i32
  }
  func.func @transform_2(%arg0: i32) -> (i32, i32) {
    %c0_i32 = arith.constant 0 : i32
    %c0_i32_0 = arith.constant 0 : i32
    %c0_i32_1 = arith.constant 0 : i32
    return %c0_i32, %c0_i32_0 : i32, i32
  }
  func.func @transform_3(%arg0: i32) -> (i32, i32) {
    %c0_i32 = arith.constant 0 : i32
    %c0_i32_0 = arith.constant 0 : i32
    %c0_i32_1 = arith.constant 0 : i32
    return %c0_i32, %c0_i32_0 : i32, i32
  }
  func.func @transform_4(%arg0: i32) -> (i32, i32) {
    %c0_i32 = arith.constant 0 : i32
    %c0_i32_0 = arith.constant 0 : i32
    %c0_i32_1 = arith.constant 0 : i32
    return %c0_i32, %c0_i32_0 : i32, i32
  }
  func.func @transform_5(%arg0: i32) -> (i32, i32) {
    %c0_i32 = arith.constant 0 : i32
    %c0_i32_0 = arith.constant 0 : i32
    %c0_i32_1 = arith.constant 0 : i32
    return %c0_i32, %c0_i32_0 : i32, i32
  }
  func.func @transform_6(%arg0: i32) -> (i32, i32) {
    %c0_i32 = arith.constant 0 : i32
    %c0_i32_0 = arith.constant 0 : i32
    %c0_i32_1 = arith.constant 0 : i32
    return %c0_i32, %c0_i32_0 : i32, i32
  }
  func.func @transform_7(%arg0: i32) -> (i32, i32) {
    %c0_i32 = arith.constant 0 : i32
    %c0_i32_0 = arith.constant 0 : i32
    %c0_i32_1 = arith.constant 0 : i32
    return %c0_i32, %c0_i32_0 : i32, i32
  }
}

</mosaic_0001>

<bundles_post_ra>
// kernel: tabular_mlp_forward.1
= control target key start
LH: loop header
LB: loop body
LE: loop exit
PB: predicated region body
PF: predicated region fallthrough
CT: control target
= control target key end

     0   :  { %v266_v0 = vmov 0.0   ;;  %vm36_vm0 = vcmask 1044480   ;;  %vm267_vm1 = vmmov 0   ;;  %vm32_vm2 = vcmask 80896   ;;  %s362_s1 = inlined_call_operand.vmem [shape: f32[10,64], index: 1, kind: input, shape index: {}]   ;;  %s363_s0 = inlined_call_operand.vmem [shape: f32[8,10], index: 0, kind: input, shape index: {}]   ;;  %s364_s4 = inlined_call_operand.vmem [shape: f32[64,32], index: 4, kind: input, shape index: {}]   ;;  %s365_s2 = inlined_call_operand.vmem [shape: f32[1,64], index: 2, kind: input, shape index: {}]   ;;  %s366_s3 = inlined_call_operand.vmem [shape: f32[1,64], index: 3, kind: input, shape index: {}]   ;;  %s367_s5 = inlined_call_operand.vmem [shape: f32[1,32], index: 5, kind: input, shape index: {}]   ;;  %s368_s6 = inlined_call_operand.vmem [shape: f32[1,32], index: 6, kind: input, shape index: {}]   ;;  %s369_s7 = inlined_call_operand.vmem [shape: f32[8,32], index: 7, kind: output, shape index: {}]  }
   0x1   :  { %242 = vmatprep.subr.bf16.mxu0 %v266_v0  ;;  %v29_v1 = vld [vmem:[%s362_s1] sm:$0xff]  ;;  %v30_v2 = vld [vmem:[%s362_s1 + $0x8] sm:$0x3]  ;;  %244 = vmatprep.mubr.msk.bf16.mxu0 %vm267_vm1, %v266_v0  ;;  %v136_v7 = vld [vmem:[%s364_s4 + $0x30] sm:$0xff]  ;;  %vm82_vm3 = vcmask 523264   ;;  %v109_v44 = vlaneseq  ;;  %vm187_vm5 = vcmask 261120  }
   0x2   :  { %v27_v3 = vld [vmem:[%s363_s0] sm:$0xff]  ;;  %v31_v4 = vpack.c.bf16 %v30_v2, %v29_v1  ;;  %248 = vmatprep.subr.bf16.mxu1 %v266_v0  ;;  %256 = vmatprep.mubr.msk.bf16.mxu1 %vm267_vm1, %v266_v0  ;;  %v137_v8 = vld [vmem:[%s364_s4 + $0x38] sm:$0xff]  ;;  %v135_v11 = vld [vmem:[%s364_s4 + $0x28] sm:$0xff] }
   0x3   :  { %v28_v6 = vpack.c.bf16 %v27_v3, %v27_v3  ;;  %v141_v9 = vpack.c.bf16 %v137_v8, %v136_v7  ;;  %v134_v10 = vld [vmem:[%s364_s4 + $0x20] sm:$0xff]  ;;  %v132_v13 = vld [vmem:[%s364_s4 + $0x10] sm:$0xff]  ;;  %v133_v14 = vld [vmem:[%s364_s4 + $0x18] sm:$0xff]  ;;  %v110_v45 = vshrl.u32 %v109_v44, 7 }
   0x4   :  { %v38_v5 = vsel %vm36_vm0, %v31_v4, 0  ;;  %v140_v12 = vpack.c.bf16 %v135_v11, %v134_v10  ;;  %v139_v15 = vpack.c.bf16 %v133_v14, %v132_v13  ;;  %v130_v16 = vld [vmem:[%s364_s4] sm:$0xff]  ;;  %v131_v17 = vld [vmem:[%s364_s4 + $0x8] sm:$0xff] }
   0x5   :  { %243 = vmatpush3.bf16.msra.mxu0 %v38_v5  ;;  %249 = vmatpush3.bf16.msra.mxu1 %v141_v9  ;;  %v138_v18 = vpack.c.bf16 %v131_v17, %v130_v16  ;;  %v80_v46 = vld [vmem:[%s365_s2] sm:$0x1]  ;;  %v111_v47 = vsub.s32 0, %v110_v45  ;;  %vm125_vm4 = vcmp.lt.s32.totalorder %v110_v45, 2 }
   0x6   :  { %250 = vmatprep.subr.bf16.mxu1 %v266_v0  ;;  %v81_v50 = vld [vmem:[%s366_s3] sm:$0x1] }
   0x8   :  { %245 = vmatmul.mubr.msk.bf16.vlgmr.msra.gmra.mxu0 %vm32_vm2, %v28_v6 }
   0x9   :  { %251 = vmatpush3.bf16.msra.mxu1 %v140_v12 }
   0xa   :  { %252 = vmatprep.subr.bf16.mxu1 %v266_v0 }
   0xd   :  { %253 = vmatpush3.bf16.msra.mxu1 %v139_v15 }
   0xe   :  { %254 = vmatprep.subr.bf16.mxu1 %v266_v0 }
  0x11   :  { %255 = vmatpush3.bf16.msra.mxu1 %v138_v18 }
  0xc8   :  { %v74_v19 = vpop.f32.mrf.mxu0 }
  0xc9   :  { %v83_v20 = vsel %vm82_vm3, %v74_v19, 0.0  ;;  %v91_v21 = vmul.f32 %v74_v19, %v74_v19 }
  0xca   :  { %v84_v22 = vrot.slane %v83_v20, 4  ;;  %v246_v23 = vpop.f32.mrf.mxu0 }
  0xcb   :  { %v92_v24 = vsel %vm82_vm3, %v91_v21, 0.0  ;;  %v185_v21 = vld [vmem:[%s367_s5] sm:$0x1] }
  0xcc   :  { %v85_v25 = vadd.f32 %v84_v22, %v83_v20  ;;  %v93_v26 = vrot.slane %v92_v24, 4  ;;  %v77_v27 = vpop.f32.mrf.mxu0 }
  0xce   :  { %v86_v28 = vrot.slane %v85_v25, 2  ;;  %v94_v29 = vadd.f32 %v93_v26, %v92_v24  ;;  %v247_v30 = vpop.f32.mrf.mxu0  ;;  %v186_v24 = vld [vmem:[%s368_s6] sm:$0x1] }
  0xd0   :  { %v87_v31 = vadd.f32 %v86_v28, %v85_v25  ;;  %v95_v32 = vrot.slane %v94_v29, 2 }
  0xd2   :  { %v88_v33 = vrot.slane %v87_v31, 1  ;;  %v96_v34 = vadd.f32 %v95_v32, %v94_v29 }
  0xd4   :  { %v89_v35 = vadd.f32 %v88_v33, %v87_v31  ;;  %v97_v36 = vrot.slane %v96_v34, 1 }
  0xd6   :  { %v90_v37 = vmul.f32 0.5, %v89_v35  ;;  %v98_v38 = vadd.f32 %v97_v36, %v96_v34 }
  0xd8   :  { %v99_v39 = vmul.f32 0.5, %v98_v38  ;;  %v100_v40 = vmul.f32 %v90_v37, %v90_v37 }
  0xda   :  { %v101_v41 = vsub.f32 %v99_v39, %v100_v40 }
  0xdc   :  { %v102_v42 = vmax.f32 %v101_v41, 0.0 }
  0xde   :  { %v103_v43 = vadd.f32 1e-05, %v102_v42 }
  0xe0   :  { %262 = vrsqrt.f32 %v103_v43 }
  0xed   :  { %v263_v48 = vpop.eup %262 }
  0xee   :  { %v105_v49 = vmul.f32 %v263_v48, %v80_v46 }
  0xf0   :  { %v106_v51 = vmul.f32 %v105_v49, %v90_v37  ;;  %v112_v52 = vrot.slane %v105_v49, %v111_v47 }
  0xf2   :  { %v107_v53 = vsub.f32 %v81_v50, %v106_v51  ;;  %v114_v54 = vmul.f32 %v112_v52, %v74_v19 }
  0xf4   :  { %v119_v55 = vrot.slane %v107_v53, %v111_v47 }
  0xf6   :  { %v121_v56 = vadd.f32 %v119_v55, %v114_v54 }
  0xf8   :  { %v122_v57 = vmax.f32 %v121_v56, 0.0 }
  0xfa   :  { %v128_v58 = vsel %vm125_vm4, %v122_v57, 0.0 }
  0xfb   :  { %v129_v59 = vpack.c.bf16 %v128_v58, %v128_v58 }
  0xfd   :  { %257 = vmatmul.mubr.msk.bf16.vlgmr.msra.gmra.mxu1 %vm82_vm3, %v129_v59 }
 0x1bd   :  { %v179_v60 = vpop.f32.mrf.mxu1 }
 0x1be   :  { %v188_v61 = vsel %vm187_vm5, %v179_v60, 0.0  ;;  %v196_v62 = vmul.f32 %v179_v60, %v179_v60 }
 0x1bf   :  { %v189_v63 = vrot.slane %v188_v61, 4  ;;  %v258_v0 = vpop.f32.mrf.mxu1 }
 0x1c0   :  { %v197_v1 = vsel %vm187_vm5, %v196_v62, 0.0 }
 0x1c1   :  { %v190_v2 = vadd.f32 %v189_v63, %v188_v61  ;;  %v198_v3 = vrot.slane %v197_v1, 4  ;;  %v182_v4 = vpop.f32.mrf.mxu1 }
 0x1c3   :  { %v191_v5 = vrot.slane %v190_v2, 2  ;;  %v199_v6 = vadd.f32 %v198_v3, %v197_v1  ;;  %v259_v7 = vpop.f32.mrf.mxu1 }
 0x1c5   :  { %v192_v8 = vadd.f32 %v191_v5, %v190_v2  ;;  %v200_v9 = vrot.slane %v199_v6, 2 }
 0x1c7   :  { %v193_v10 = vrot.slane %v192_v8, 1  ;;  %v201_v11 = vadd.f32 %v200_v9, %v199_v6 }
 0x1c9   :  { %v194_v12 = vadd.f32 %v193_v10, %v192_v8  ;;  %v202_v13 = vrot.slane %v201_v11, 1 }
 0x1cb   :  { %v195_v14 = vmul.f32 0.5, %v194_v12  ;;  %v203_v15 = vadd.f32 %v202_v13, %v201_v11 }
 0x1cd   :  { %v204_v16 = vmul.f32 0.5, %v203_v15  ;;  %v205_v17 = vmul.f32 %v195_v14, %v195_v14 }
 0x1cf   :  { %v206_v18 = vsub.f32 %v204_v16, %v205_v17 }
 0x1d1   :  { %v207_v19 = vmax.f32 %v206_v18, 0.0 }
 0x1d3   :  { %v208_v20 = vadd.f32 1e-05, %v207_v19 }
 0x1d5   :  { %264 = vrsqrt.f32 %v208_v20 }
 0x1e2   :  { %v265_v22 = vpop.eup %264 }
 0x1e3   :  { %v210_v23 = vmul.f32 %v265_v22, %v185_v21 }
 0x1e5   :  { %v211_v25 = vmul.f32 %v210_v23, %v195_v14  ;;  %v217_v26 = vrot.slane %v210_v23, %v111_v47 }
 0x1e7   :  { %v212_v27 = vsub.f32 %v186_v24, %v211_v25  ;;  %v219_v28 = vmul.f32 %v217_v26, %v179_v60 }
 0x1e9   :  { %v224_v29 = vrot.slane %v212_v27, %v111_v47 }
 0x1eb   :  { %v226_v30 = vadd.f32 %v224_v29, %v219_v28 }
 0x1ed   :  { %v227_v31 = vmax.f32 %v226_v30, 0.0 }
 0x1ef   :  { %228 = vst.msk [vmem:[%s369_s7] sm:$0xff] %vm187_vm5, %v227_v31 }

</bundles_post_ra>
